<compile_context>
chip_gen: v7x
topology: tpu7x:2x2x1
jax: 0.10.0
libtpu: 0.0.40
codegen_flags: <defaults>
</compile_context>

<pallas_src>
import functools
from typing import NamedTuple

import numpy as np

import jax
import jax.numpy as jnp
from jax import lax
from jax.experimental import pallas as pl
from jax.experimental.pallas import tpu as pltpu

_LANE = 128
_SUBLANE = 8

_HAS_BUFFERED = hasattr(pl, "Buffered")


def _round_up(v, m):
    return (v + m - 1) // m * m


# ----------------------------------------------------------------------------
# Stateless in-kernel dropout mask: hash(global_row, col, seed, salt) -> keep.
# Pure jnp/lax integer ops only (portable across Mosaic + interpret mode).
# The 1/(1-p) keep-scale is folded into the weights, so the kernel only selects.
# ----------------------------------------------------------------------------
def _keep_mask(shape, row0, seed, salt, droprate):
    rows = lax.broadcasted_iota(jnp.int32, shape, 0) + row0
    cols = lax.broadcasted_iota(jnp.int32, shape, 1)
    mixed = (rows * np.int32(-1640531527)        # 0x9E3779B9
             + cols * np.int32(-2049301877)      # 0x85EBCA6B
             + seed * np.int32(-1028477387)      # 0xC2B2AE35
             + np.int32(salt))
    h = mixed.astype(jnp.uint32)
    # murmur3-style finalizer (logical shifts on uint32)
    h = h ^ (h >> 16)
    h = h * np.uint32(0x7FEB352D)
    h = h ^ (h >> 15)
    h = h * np.uint32(0x846CA68B)
    h = h ^ (h >> 16)
    # compare the top 31 bits with a signed compare: P(keep) = 1 - droprate
    r = (h >> 1).astype(jnp.int32)
    thr = np.int32(min(int(round(droprate * 2147483648.0)), 2147483647))
    return r >= thr


def _mlp_grand_kernel(seed_ref, x_ref, w1_ref, b1_ref, w2_ref, b2_ref, o_ref, *,
                      tm, training, input_droprate, hidden_droprate):
    x = x_ref[...]                          # (tm, nfeat)
    if x.dtype != w1_ref.dtype:
        x = x.astype(w1_ref.dtype)          # feed the MXU its compute dtype

    if training and (input_droprate > 0.0 or hidden_droprate > 0.0):
        row0 = pl.program_id(0) * tm        # global row offset of this tile
        seed = seed_ref[0]                  # int32 scalar from SMEM

    if training and input_droprate > 0.0:
        if input_droprate >= 1.0:
            x = jnp.zeros_like(x)
        else:
            keep = _keep_mask(x.shape, row0, seed, 1, input_droprate)
            x = jnp.where(keep, x, jnp.zeros_like(x))

    # layer1 + ReLU (train-mode 1/(1-input_droprate) scale is folded into W1).
    h = jnp.dot(x, w1_ref[...], preferred_element_type=jnp.float32)
    h = jnp.maximum(h + b1_ref[...], 0.0)

    if training and hidden_droprate > 0.0:
        if hidden_droprate >= 1.0:
            h = jnp.zeros_like(h)
        else:
            keep = _keep_mask(h.shape, row0, seed, 2, hidden_droprate)
            h = jnp.where(keep, h, jnp.zeros_like(h))

    # layer2 (1/(1-hidden_droprate) folded into W2); f32 accumulation.
    out = jnp.dot(h.astype(w2_ref.dtype), w2_ref[...],
                  preferred_element_type=jnp.float32)
    o_ref[...] = (out + b2_ref[...]).astype(o_ref.dtype)


# ----------------------------------------------------------------------------
# Parameter preparation (do this ONCE per mode, reuse across forward calls).
# ----------------------------------------------------------------------------
class MLPGrandParams(NamedTuple):
    w1: jax.Array        # (nfeat, nhid_p)   compute dtype, dropout scale folded in
    b1: jax.Array        # (1, nhid_p)       f32
    w2: jax.Array        # (nhid_p, nclass_p) compute dtype, dropout scale folded in
    b2: jax.Array        # (1, nclass_p)     f32
    nclass: int
    training: bool
    input_droprate: float
    hidden_droprate: float


def prepare_mlp_grand_params(w1, b1, w2, b2, *, compute_dtype=jnp.bfloat16,
                             training=False, input_droprate=0.0,
                             hidden_droprate=0.0):
    """Pad to lane-dense widths, cast to the MXU dtype and fold the training
    dropout keep-scale into the weights, once."""
    nfeat, nhid = w1.shape
    nhid2, nclass = w2.shape
    assert nhid2 == nhid and b1.shape == (nhid,) and b2.shape == (nclass,)
    nhid_p = _round_up(nhid, _LANE)
    nclass_p = _round_up(nclass, _LANE)

    s1 = 1.0 / (1.0 - input_droprate) if (training and 0.0 < input_droprate < 1.0) else 1.0
    s2 = 1.0 / (1.0 - hidden_droprate) if (training and 0.0 < hidden_droprate < 1.0) else 1.0

    w1p = jnp.zeros((nfeat, nhid_p), compute_dtype)
    w1p = w1p.at[:, :nhid].set((w1.astype(jnp.float32) * s1).astype(compute_dtype))
    b1p = jnp.zeros((1, nhid_p), jnp.float32).at[0, :nhid].set(b1.astype(jnp.float32))
    w2p = jnp.zeros((nhid_p, nclass_p), compute_dtype)
    w2p = w2p.at[:nhid, :nclass].set((w2.astype(jnp.float32) * s2).astype(compute_dtype))
    b2p = jnp.zeros((1, nclass_p), jnp.float32).at[0, :nclass].set(b2.astype(jnp.float32))

    return MLPGrandParams(w1p, b1p, w2p, b2p, int(nclass), bool(training),
                          float(input_droprate), float(hidden_droprate))


def _vmem_plan():
    """(budget_bytes, vmem_limit_bytes, tm_cap, split_for_two_cores)."""
    try:
        kind = jax.devices()[0].device_kind.lower()
    except Exception:
        kind = ""
    if ("v5" in kind) or ("v6" in kind):
        # 128-MiB-VMEM generations: use a large slice of it.
        return 56 << 20, 96 << 20, 2048, False
    # v7x (64 MiB phys / 32 MiB scoped) or unknown backend: stay conservative
    # and make sure both TensorCores get at least one row tile each.
    return 22 << 20, 32 << 20, 1024, True


def _resident_spec(shape):
    # Constant-index weight/bias blocks: single-buffer them so they don't pay
    # the default 2x VMEM.
    idx = lambda i, seed: (0, 0)
    if _HAS_BUFFERED:
        return pl.BlockSpec(shape, idx, pipeline_mode=pl.Buffered(1))
    return pl.BlockSpec(shape, idx)


def mlp_grand_forward(x, params: MLPGrandParams, *, seed=0):
    """x: (N, nfeat) -> logits (N, nclass)."""
    assert x.ndim == 2
    N, nfeat = x.shape
    assert params.w1.shape[0] == nfeat
    nhid_p = params.w1.shape[1]
    nclass_p = params.w2.shape[1]

    out_dtype = x.dtype
    compute_dtype = params.w1.dtype
    if x.dtype != compute_dtype:
        # Halves the x HBM stream when compute_dtype is bf16.  In a GRAND-style
        # loop (many forwards over the same x), pre-cast x once outside instead.
        x = x.astype(compute_dtype)

    budget, vmem_limit, tm_cap, split_for_two_cores = _vmem_plan()

    w_item = jnp.dtype(compute_dtype).itemsize
    x_item = jnp.dtype(x.dtype).itemsize
    o_item = jnp.dtype(out_dtype).itemsize
    weight_factor = 1 if _HAS_BUFFERED else 2    # resident weights single-buffered
    weight_bytes = weight_factor * (w_item * (nfeat * nhid_p + nhid_p * nclass_p)
                                    + 4 * (nhid_p + nclass_p))
    per_row = (2 * x_item * nfeat          # x tile, double-buffered
               + 2 * o_item * nclass_p     # out tile, double-buffered
               + 4 * nhid_p                # f32 hidden activations
               + 4 * nclass_p)             # f32 output accumulator
    if params.training and (params.input_droprate > 0.0 or params.hidden_droprate > 0.0):
        per_row += 4 * nfeat + 4 * nhid_p  # hash bits / keep-mask temporaries

    # TODO(synk): no K/nhid tiling fallback -- if the resident weights alone
    #             exceed the VMEM budget this clamps tm to 8 and may not fit.
    tm = max(_SUBLANE, (budget - weight_bytes) // per_row)
    tm = max(_SUBLANE, min(tm, tm_cap) // _SUBLANE * _SUBLANE)
    tm = min(tm, _round_up(N, _SUBLANE))
    if split_for_two_cores and N > _SUBLANE:
        tm = min(tm, _round_up(pl.cdiv(N, 2), _SUBLANE))   # >=2 grid steps (v7x)

    grid = (pl.cdiv(N, tm),)
    seed_arr = jnp.asarray([seed], dtype=jnp.int32)

    kernel = functools.partial(
        _mlp_grand_kernel, tm=tm, training=params.training,
        input_droprate=params.input_droprate,
        hidden_droprate=params.hidden_droprate)

    out_p = pl.pallas_call(
        kernel,
        out_shape=jax.ShapeDtypeStruct((N, nclass_p), out_dtype),
        grid_spec=pltpu.PrefetchScalarGridSpec(
            num_scalar_prefetch=1,                                # seed -> SMEM
            grid=grid,
            in_specs=[
                pl.BlockSpec((tm, nfeat), lambda i, seed: (i, 0)),  # x streams
                _resident_spec((nfeat, nhid_p)),                    # W1 resident
                _resident_spec((1, nhid_p)),                        # b1 resident
                _resident_spec((nhid_p, nclass_p)),                 # W2 resident
                _resident_spec((1, nclass_p)),                      # b2 resident
            ],
            out_specs=pl.BlockSpec((tm, nclass_p), lambda i, seed: (i, 0)),
        ),
        compiler_params=pltpu.CompilerParams(
            dimension_semantics=(pltpu.PARALLEL,),
            vmem_limit_bytes=vmem_limit,
        ),
    )(seed_arr, x, params.w1, params.b1, params.w2, params.b2)

    # TODO(synk): callers that can consume the padded (N, nclass_p) slab should
    #             skip this slice (saves an extra HBM pass).
    return out_p[:, :params.nclass]


if __name__ == "__main__":
    # Small deterministic example consistent with MLP_Grand(nfeat, nhid, nclass, ...)
    N, nfeat, nhid, nclass = 64, 48, 32, 7
    input_droprate, hidden_droprate = 0.5, 0.5

    key = jax.random.PRNGKey(0)
    kx, kw1, kb1, kw2, kb2 = jax.random.split(key, 5)

    x = jax.random.normal(kx, (N, nfeat), dtype=jnp.float32)

    # MLPLayer-style uniform(-stdv, stdv) init.
    stdv1 = 1.0 / (nhid ** 0.5)
    w1 = jax.random.uniform(kw1, (nfeat, nhid), jnp.float32, -stdv1, stdv1)
    b1 = jax.random.uniform(kb1, (nhid,), jnp.float32, -stdv1, stdv1)
    stdv2 = 1.0 / (nclass ** 0.5)
    w2 = jax.random.uniform(kw2, (nhid, nclass), jnp.float32, -stdv2, stdv2)
    b2 = jax.random.uniform(kb2, (nclass,), jnp.float32, -stdv2, stdv2)

    # --- eval mode, f32 compute path vs pure-JAX reference -------------------
    p_f32 = prepare_mlp_grand_params(w1, b1, w2, b2, compute_dtype=jnp.float32,
                                     training=False,
                                     input_droprate=input_droprate,
                                     hidden_droprate=hidden_droprate)
    out_f32 = jax.block_until_ready(mlp_grand_forward(x, p_f32))
    ref_f32 = jnp.maximum(x @ w1 + b1[None, :], 0.0) @ w2 + b2[None, :]
    assert out_f32.shape == (N, nclass)
    assert jnp.allclose(out_f32, ref_f32, atol=1e-2, rtol=1e-2), "f32 path mismatch"

    # --- eval mode, default bf16 MXU path vs bf16-mirrored reference ---------
    p_bf16 = prepare_mlp_grand_params(w1, b1, w2, b2,     # compute_dtype=bfloat16
                                      training=False,
                                      input_droprate=input_droprate,
                                      hidden_droprate=hidden_droprate)
    out_bf16 = jax.block_until_ready(mlp_grand_forward(x, p_bf16))
    xb, w1b, w2b = (a.astype(jnp.bfloat16) for a in (x, w1, w2))
    h_ref = jnp.maximum(
        jnp.dot(xb, w1b, preferred_element_type=jnp.float32) + b1[None, :], 0.0)
    ref_bf16 = jnp.dot(h_ref.astype(jnp.bfloat16), w2b,
                       preferred_element_type=jnp.float32) + b2[None, :]
    assert out_bf16.shape == (N, nclass)
    assert jnp.allclose(out_bf16, ref_bf16, atol=1e-2, rtol=1e-2), "bf16 path mismatch"

    # --- training mode: dropout active (stateless in-kernel hash PRNG) -------
    p_train = prepare_mlp_grand_params(w1, b1, w2, b2, training=True,
                                       input_droprate=input_droprate,
                                       hidden_droprate=hidden_droprate)
    out_tr = jax.block_until_ready(mlp_grand_forward(x, p_train, seed=123))
    assert out_tr.shape == (N, nclass)
    assert bool(jnp.all(jnp.isfinite(out_tr)))

    print("KERNEL_OK")
</pallas_src>

<mosaic_0001>
module attributes {stable_mosaic.version = 11 : i64} {
  func.func @_mlp_grand_kernel(%arg0: i32, %arg1: memref<1xi32, #tpu.memory_space<smem>>, %arg2: memref<32x48xf32, #tpu.memory_space<vmem>>, %arg3: memref<48x128xf32, #tpu.memory_space<vmem>>, %arg4: memref<1x128xf32, #tpu.memory_space<vmem>>, %arg5: memref<128x128xf32, #tpu.memory_space<vmem>>, %arg6: memref<1x128xf32, #tpu.memory_space<vmem>>, %arg7: memref<32x128xf32, #tpu.memory_space<vmem>>) attributes {dimension_semantics = [#tpu.dimension_semantics<parallel>], iteration_bounds = array<i64: 2>, scalar_prefetch = 1 : i64, scratch_operands = 0 : i64, tpu.core_type = #tpu.core_type<tc>, window_params = [{transform_indices = @transform_0, window_bounds = array<i64: 32, 48>}, {pipeline_mode = #tpu.pipeline_mode<synchronous>, transform_indices = @transform_1, window_bounds = array<i64: 48, 128>}, {pipeline_mode = #tpu.pipeline_mode<synchronous>, transform_indices = @transform_2, window_bounds = array<i64: 1, 128>}, {pipeline_mode = #tpu.pipeline_mode<synchronous>, transform_indices = @transform_3, window_bounds = array<i64: 128, 128>}, {pipeline_mode = #tpu.pipeline_mode<synchronous>, transform_indices = @transform_4, window_bounds = array<i64: 1, 128>}, {transform_indices = @transform_5, window_bounds = array<i64: 32, 128>}]} {
    %c0 = arith.constant 0 : index
    %c0_0 = arith.constant 0 : index
    %0 = vector.load %arg2[%c0, %c0_0] : memref<32x48xf32, #tpu.memory_space<vmem>>, vector<32x48xf32>
    %c0_1 = arith.constant 0 : index
    %c0_2 = arith.constant 0 : index
    %1 = vector.load %arg3[%c0_1, %c0_2] : memref<48x128xf32, #tpu.memory_space<vmem>>, vector<48x128xf32>
    %cst = arith.constant dense<0.000000e+00> : vector<32x128xf32>
    %2 = tpu.matmul %0, %1, %cst {dimension_numbers = #tpu.dot_dimension_numbers<[1], [0], [0], [1], [0, 0, 1, 1], [], []>} : vector<32x48xf32>, vector<48x128xf32>, vector<32x128xf32> -> vector<32x128xf32>
    %c0_3 = arith.constant 0 : index
    %c0_4 = arith.constant 0 : index
    %3 = vector.load %arg4[%c0_3, %c0_4] : memref<1x128xf32, #tpu.memory_space<vmem>>, vector<1x128xf32>
    %4 = vector.broadcast %3 : vector<1x128xf32> to vector<32x128xf32>
    %5 = arith.addf %2, %4 : vector<32x128xf32>
    %cst_5 = arith.constant 0.000000e+00 : f32
    %6 = vector.broadcast %cst_5 : f32 to vector<32x128xf32>
    %7 = arith.maximumf %5, %6 : vector<32x128xf32>
    %c0_6 = arith.constant 0 : index
    %c0_7 = arith.constant 0 : index
    %8 = vector.load %arg5[%c0_6, %c0_7] : memref<128x128xf32, #tpu.memory_space<vmem>>, vector<128x128xf32>
    %cst_8 = arith.constant dense<0.000000e+00> : vector<32x128xf32>
    %9 = tpu.matmul %7, %8, %cst_8 {dimension_numbers = #tpu.dot_dimension_numbers<[1], [0], [0], [1], [0, 0, 1, 1], [], []>} : vector<32x128xf32>, vector<128x128xf32>, vector<32x128xf32> -> vector<32x128xf32>
    %c0_9 = arith.constant 0 : index
    %c0_10 = arith.constant 0 : index
    %10 = vector.load %arg6[%c0_9, %c0_10] : memref<1x128xf32, #tpu.memory_space<vmem>>, vector<1x128xf32>
    %11 = vector.broadcast %10 : vector<1x128xf32> to vector<32x128xf32>
    %12 = arith.addf %9, %11 : vector<32x128xf32>
    %c0_11 = arith.constant 0 : index
    %c0_12 = arith.constant 0 : index
    %13 = vector.load %arg7[%c0_11, %c0_12] : memref<32x128xf32, #tpu.memory_space<vmem>>, vector<32x128xf32>
    tpu.vector_store %arg7[%c0_11, %c0_12], %12 {strides = array<i32>} : memref<32x128xf32, #tpu.memory_space<vmem>>, vector<32x128xf32>,
    return
  }
  func.func @transform_0(%arg0: i32, %arg1: memref<1xi32, #tpu.memory_space<smem>>) -> (i32, i32) {
    %c0_i32 = arith.constant 0 : i32
    %c0_i32_0 = arith.constant 0 : i32
    return %arg0, %c0_i32 : i32, i32
  }
  func.func @transform_1(%arg0: i32, %arg1: memref<1xi32, #tpu.memory_space<smem>>) -> (i32, i32) {
    %c0_i32 = arith.constant 0 : i32
    %c0_i32_0 = arith.constant 0 : i32
    %c0_i32_1 = arith.constant 0 : i32
    return %c0_i32, %c0_i32_0 : i32, i32
  }
  func.func @transform_2(%arg0: i32, %arg1: memref<1xi32, #tpu.memory_space<smem>>) -> (i32, i32) {
    %c0_i32 = arith.constant 0 : i32
    %c0_i32_0 = arith.constant 0 : i32
    %c0_i32_1 = arith.constant 0 : i32
    return %c0_i32, %c0_i32_0 : i32, i32
  }
  func.func @transform_3(%arg0: i32, %arg1: memref<1xi32, #tpu.memory_space<smem>>) -> (i32, i32) {
    %c0_i32 = arith.constant 0 : i32
    %c0_i32_0 = arith.constant 0 : i32
    %c0_i32_1 = arith.constant 0 : i32
    return %c0_i32, %c0_i32_0 : i32, i32
  }
  func.func @transform_4(%arg0: i32, %arg1: memref<1xi32, #tpu.memory_space<smem>>) -> (i32, i32) {
    %c0_i32 = arith.constant 0 : i32
    %c0_i32_0 = arith.constant 0 : i32
    %c0_i32_1 = arith.constant 0 : i32
    return %c0_i32, %c0_i32_0 : i32, i32
  }
  func.func @transform_5(%arg0: i32, %arg1: memref<1xi32, #tpu.memory_space<smem>>) -> (i32, i32) {
    %c0_i32 = arith.constant 0 : i32
    %c0_i32_0 = arith.constant 0 : i32
    return %arg0, %c0_i32 : i32, i32
  }
}

</mosaic_0001>

<bundles_post_ra>
// kernel: tpu_custom_call.1
= control target key start
LH: loop header
LB: loop body
LE: loop exit
PB: predicated region body
PF: predicated region fallthrough
CT: control target
= control target key end

     0   :  { %12 = vsyncpa [#allocation5], 0  ;;  %s1075_s0 = inlined_call_operand.<no memory space> [shape: s32[1], index: 0, kind: input, shape index: {}]   ;;  %s1076_s1 = inlined_call_operand.vmem [shape: f32[64,48], index: 1, kind: input, shape index: {}]   ;;  %s1077_s2 = inlined_call_operand.vmem [shape: f32[48,128], index: 2, kind: input, shape index: {}]   ;;  %s1078_s3 = inlined_call_operand.vmem [shape: f32[1,128], index: 3, kind: input, shape index: {}]   ;;  %s1079_s4 = inlined_call_operand.hbm [shape: f32[128,128], index: 4, kind: input, shape index: {}]   ;;  %s1080_s5 = inlined_call_operand.vmem [shape: f32[1,128], index: 5, kind: input, shape index: {}]   ;;  %s1081_s6 = inlined_call_operand.hbm [shape: f32[64,128], index: 6, kind: output, shape index: {}]  }
   0x1   :  { %13 = vsyncpa [#allocation6], 0 }
   0x2   :  { %15 = vsyncpa [#allocation6 + $0x1], 0  ;;  %s904_s0 = smov 0   ;;  %s906_s21 = smov 0  }
   0x3   :  { %s908_s22 = smov 0   ;;  %s910_s23 = smov 0  }
   0x4 LB: > { %s925_s24 = sadd.s32 4294967295, %s861_s23   ;;  %s562_s25 = sadd.s32 4294967294, %s861_s23   ;;  %s861_s23 = sphi %s910_s23, %s1097_s23   ;;  %s857_s22 = sphi %s908_s22, %s1096_s22   ;;  %s853_s21 = sphi %s906_s21, %s1095_s21   ;;  %s849_s0 = sphi %s904_s0, %s1094_s0  }
   0x5   : > { %s929_s26 = sadd.s32 1, %s861_s23   ;;  %s138_s27 = sadd.s32 1, %s857_s22 }
   0x6   : > { %s135_s28 = ssub.s32 %s861_s23, %s929_s26  ;;  %p148_p0 = scmp.ne.s32.totalorder %s857_s22, %s853_s21 }
   0x7   : > { %p136_p1 = scmp.eq.s32.totalorder %s135_s28, 0  ;;  %p149_p2 = scmp.eq.s32.totalorder %s925_s24, 1 }
   0x8   : > { %p154_p3 = scmp.ne.s32.totalorder %s853_s21, %s849_s0  ;;  %p155_p4 = scmp.eq.s32.totalorder %s562_s25, 1 }
   0x9   : > { %s940_s29 = scalar_select %p136_p1, %s857_s22, %s138_s27  }
   0xa   : > { %p942_p5 = por %p149_p2, %p148_p0  ;;  %p946_p6 = por %p155_p4, %p154_p3 }
   0xb   : > { %p563_p7 = scmp.ge.s32.totalorder %s861_s23, 1  ;;  %p162_p8 = scmp.lt.s32.totalorder %s861_s23, 3 }
   0xc   : > { %s1085_s30 = scalar_select %p942_p5, 1, 0 }
   0xd   : > { %s1086_s7 = scalar_select %p946_p6, 1, 0 }
   0xe   : > { %p1082_p9 = scmp.eq.s32.totalorder %s925_s24, 0  ;;  %p953_p10 = pnand %p563_p7, %p162_p8 }
   0xf   : > { %s863_s9 = smov [#allocation4]   ;;  %s767_s14 = scalar_lea.hbm %s1079_s4, 2048 }
  0x10   : > { %s1087_s8 = scalar_select %p953_p10, 1, 0 }
  0x11   : > { %s180_s10 = sshll.u32 %s863_s9, 4  ;;  %p719_p11 = pneg %p953_p10  ;;  %s181_s10 = int_to_ptr.vmem [resolvable:$true] %s180_s10 }
  0x12   : > { %p768_p13 = scmp.ne.s32.totalorder %s1079_s4, %s767_s14  ;;  %p774_p3 = scmp.lt.u32.totalorder %s767_s14, %s1079_s4 }
  0x13   : > { %p961_p12 = pnand %p1082_p9, %p719_p11 }
  0x15   : > { %p769_p0 = pneg %p961_p12 }
  0x17   : > { %p770_p1 = pnand %p769_p0, %p768_p13 }
  0x19   : > { %p771_p2 = pneg %p770_p1 }
  0x1b   : > { %p776_p4 = pnand %p774_p3, %p771_p2 }
  0x1d   : > { %779 = shalt.err (!%p776_p4)
}
  0x1e   : > { %s780_s19 = scalar_lea.vmem %s181_s10, 2048  ;;  %p788_p9 = scmp.lt.s32.totalorder %s181_s10, %s181_s10 }
  0x1f   : > { %p781_p7 = scmp.ne.s32.totalorder %s181_s10, %s780_s19  ;;  %p789_p6 = scmp.lt.s32.totalorder %s780_s19, %s780_s19 }
  0x21   : > { %p783_p8 = pnand %p781_p7, %p769_p0  ;;  %p790_p5 = por %p789_p6, %p788_p9 }
  0x23   : > { %p784_p11 = pneg %p783_p8 }
  0x25   : > { %p791_p10 = pnand %p790_p5, %p784_p11 }
  0x27   : > { %794 = shalt.err (!%p791_p10)
}
  0x28   : > { %s864_s20 = smov 128   ;;  %s865_s25 = smov 8  }
  0x29   : > { %722 = dma.hbm_to_vmem [thread:$0]  (!%p961_p12), %s1079_s4, 2048, %s181_s10, [#allocation5], %s864_s20, %s864_s20, %s865_s25  }
  0x2a   : > { %p1089_p13 = scmp.ne.s32.totalorder %s1087_s8, 0 }
  0x2b   : > { %p1090_p1 = scmp.eq.s32.totalorder (!%p1089_p13), %s925_s24, 0 }
  0x2c   : > { %208 = sbr.rel (%p1089_p13) target bundleno = 519 (0x207), region = 40 }
  0x33   : > { %840 = dma.done.wait (%p1090_p1), [#allocation5], 2048   ;;  %p1091_p0 = pmov %p1090_p1 }
  0x34   : > { %s569_s9 = sshll.u32 %s925_s24, 2  ;;  %v247_v0 = vld [vmem:[%s1077_s2] sm:$0xff]  ;;  %v248_v1 = vld [vmem:[%s1077_s2 + $0x8] sm:$0xff]  ;;  %v249_v2 = vld [vmem:[%s1077_s2 + $0x10] sm:$0xff]  ;;  %vm260_vm0 = vcmask 392192   ;;  %s233_s11 = sand.u32 1, %s853_s21  }
  0x35   : > { %842 = vsyncadd (%p1091_p0), [#allocation5], 4294965248  ;;  %p237_p5 = scmp.lt.s32.totalorder %s569_s9, 7  ;;  %v669_v3 = vpack.c.bf16 %v248_v1, %v247_v0  ;;  %v250_v4 = vld [vmem:[%s1077_s2 + $0x18] sm:$0xff]  ;;  %v251_v6 = vld [vmem:[%s1077_s2 + $0x20] sm:$0xff]  ;;  %s582_s17 = sshll.u32 %s925_s24, 9 }
  0x36   : > { %v673_v5 = vpack.c.bf16 %v250_v4, %v249_v2  ;;  %v252_v7 = vld [vmem:[%s1077_s2 + $0x28] sm:$0xff]  ;;  %v362_v9 = vld [vmem:[#allocation4] sm:$0xff]  ;;  %v364_v12 = vld [vmem:[#allocation4 + $0x10] sm:$0xff]  ;;  %s1032_s20 = scalar_lea.hbm %s1081_s6, %s582_s17  ;;  %s1034_s25 = scalar_lea.sflag [#allocation6], %s233_s11 }
  0x37   : > { %s1099_s9 = smov (!%p237_p5, %s569_s9), 7  ;;  %670 = vmatprep.subr.bf16.mxu0 %v669_v3  ;;  %v363_v10 = vld [vmem:[#allocation4 + $0x8] sm:$0xff]  ;;  %v365_v13 = vld [vmem:[#allocation4 + $0x18] sm:$0xff]  ;;  %v677_v14 = vpack.c.bf16 %v252_v7, %v251_v6  ;;  %v366_v16 = vld [vmem:[#allocation4 + $0x20] sm:$0xff]  ;;  %p1092_p9 = scmp.ne.s32.totalorder %s1085_s30, 0 }
  0x38   : > { %s570_s12 = sshll.u32 %s1099_s9, 3  ;;  %672 = vmatpush3.bf16.msra.mxu0 %v669_v3  ;;  %v681_v11 = vpack.c.bf16 %v363_v10, %v362_v9  ;;  %v685_v15 = vpack.c.bf16 %v365_v13, %v364_v12  ;;  %v367_v17 = vld [vmem:[#allocation4 + $0x28] sm:$0xff]  ;;  %v368_v19 = vld [vmem:[#allocation4 + $0x30] sm:$0xff]  ;;  %v369_v20 = vld [vmem:[#allocation4 + $0x38] sm:$0xff]  ;;  %s866_s27 = smov [#allocation7]  }
  0x39   : > { %s991_s14 = scalar_lea.vmem %s1076_s1, %s570_s12  ;;  %674 = vmatprep.subr.bf16.mxu0 %v673_v5  ;;  %v689_v18 = vpack.c.bf16 %v367_v17, %v366_v16  ;;  %v693_v22 = vpack.c.bf16 %v369_v20, %v368_v19  ;;  %v370_v24 = vld [vmem:[#allocation4 + $0x40] sm:$0xff]  ;;  %v371_v25 = vld [vmem:[#allocation4 + $0x48] sm:$0xff]  ;;  %v372_v28 = vld [vmem:[#allocation4 + $0x50] sm:$0xff]  ;;  %s799_s28 = sshll.u32 %s866_s27, 4  ;;  %s800_s28 = int_to_ptr.vmem [resolvable:$false] %s799_s28 }
  0x3a   : > { %v243_v8 = vld [vmem:[%s991_s14] sm:$0xff]  ;;  %682 = vmatprep.subr.bf16.mxu1 %v681_v11  ;;  %v244_v21 = vld [vmem:[%s991_s14 + $0x8] sm:$0xff]  ;;  %v245_v23 = vld [vmem:[%s991_s14 + $0x10] sm:$0xff]  ;;  %v697_v27 = vpack.c.bf16 %v371_v25, %v370_v24  ;;  %s801_s9 = scalar_lea.vmem %s800_s28, 1024 }
  0x3b   : > { %625 = vmatprep.mubr.msk.f32.mxu0 %vm260_vm0, %v243_v8  ;;  %684 = vmatpush3.bf16.msra.mxu1 %v681_v11  ;;  %v246_v26 = vld [vmem:[%s991_s14 + $0x18] sm:$0xff]  ;;  %v374_v31 = vld [vmem:[#allocation4 + $0x60] sm:$0xff]  ;;  %v375_v32 = vld [vmem:[#allocation4 + $0x68] sm:$0xff]  ;;  %s568_s14 = sshll.u32 %s233_s11, 5 }
  0x3c   : > { %676 = vmatpush3.bf16.msra.mxu0 %v673_v5  ;;  %686 = vmatprep.subr.bf16.mxu1 %v685_v15  ;;  %v373_v29 = vld [vmem:[#allocation4 + $0x58] sm:$0xff]  ;;  %v705_v33 = vpack.c.bf16 %v375_v32, %v374_v31  ;;  %v376_v34 = vld [vmem:[#allocation4 + $0x70] sm:$0xff]  ;;  %v571_v37 = vld [vmem:[%s1078_s3] ss:$0 sm:$0xff]  ;;  %s235_s8 = scalar_lea.vmem [#allocation7], %s568_s14 }
  0x3d   : > { %678 = vmatprep.subr.bf16.mxu0 %v677_v14  ;;  %v701_v30 = vpack.c.bf16 %v373_v29, %v372_v28  ;;  %v377_v35 = vld [vmem:[#allocation4 + $0x78] sm:$0xff]  ;;  %v576_v50 = vld [vmem:[%s1080_s5] ss:$0 sm:$0xff]  ;;  %s488_s16 = sshll.u32 %s235_s8, 4  ;;  %s1027_s16 = int_to_ptr.vmem [resolvable:$true] %s488_s16 }
  0x3e   : > { %v709_v36 = vpack.c.bf16 %v377_v35, %v376_v34  ;;  %s795_s24 = scalar_lea.vmem %s1027_s16, 512  ;;  %p802_p2 = scmp.lt.s32.totalorder %s1027_s16, %s800_s28 }
  0x3f   : > { %688 = vmatpush3.bf16.msra.mxu1 %v685_v15  ;;  %p796_p6 = scmp.ne.s32.totalorder %s1027_s16, %s795_s24  ;;  %p803_p3 = scmp.lt.s32.totalorder %s801_s9, %s795_s24 }
  0x40   : > { %680 = vmatpush3.bf16.msra.mxu0 %v677_v14  ;;  %690 = vmatprep.subr.bf16.mxu1 %v689_v18 }
  0x41   : > { %p797_p10 = pnand %p796_p6, %p1092_p9  ;;  %p804_p4 = por %p803_p3, %p802_p2 }
  0x43   : > { %626 = vmatmul.mubr.msk.f32.vlgmr.msra.gmra.mrb[0].mxu0 %vm260_vm0, %v244_v21  ;;  %692 = vmatpush3.bf16.msra.mxu1 %v689_v18  ;;  %p798_p12 = pneg %p797_p10 }
  0x44   : > { %628 = vmatprep.mubr.msk.f32.mxu0 %vm260_vm0, %v245_v23  ;;  %694 = vmatprep.subr.bf16.mxu1 %v693_v22 }
  0x45   : > { %p805_p7 = pnand %p804_p4, %p798_p12 }
  0x47   : > { %629 = vmatmul.mubr.msk.f32.gmra.mrb[2].mxu0 %vm260_vm0, %v246_v26  ;;  %696 = vmatpush3.bf16.msra.mxu1 %v693_v22 }
  0x48   : > { %698 = vmatprep.subr.bf16.mxu1 %v697_v27 }
  0x4b   : > { %700 = vmatpush3.bf16.msra.mxu1 %v697_v27 }
  0x4c   : > { %702 = vmatprep.subr.bf16.mxu1 %v701_v30 }
  0x4f   : > { %704 = vmatpush3.bf16.msra.mxu1 %v701_v30 }
  0x50   : > { %706 = vmatprep.subr.bf16.mxu1 %v705_v33 }
  0x53   : > { %708 = vmatpush3.bf16.msra.mxu1 %v705_v33 }
  0x54   : > { %710 = vmatprep.subr.bf16.mxu1 %v709_v36 }
  0x57   : > { %712 = vmatpush3.bf16.msra.mxu1 %v709_v36 }
 0x116   : > { %v627_v38 = vpop.f32.mrb[0].mxu0 }
 0x117   : > { %v345_v39 = vadd.f32 %v627_v38, %v571_v37  ;;  %v339_v40 = vpop.f32.mrb[1].mxu0 }
 0x118   : > { %v340_v41 = vadd.f32 %v571_v37, %v339_v40 }
 0x119   : > { %v359_v44 = vmax.f32 %v345_v39, 0.0 }
 0x11a   : > { %v630_v42 = vpop.f32.mrb[2].mxu0  ;;  %v358_v43 = vmax.f32 %v340_v41, 0.0 }
 0x11b   : > { %v355_v45 = vadd.f32 %v630_v42, %v571_v37  ;;  %v349_v46 = vpop.f32.mrb[3].mxu0 }
 0x11c   : > { %v350_v47 = vadd.f32 %v571_v37, %v349_v46  ;;  %663 = vmatprep.mubr.f32.mxu1 %v358_v43 }
 0x11d   : > { %664 = vmatmul.mubr.f32.vlgmr.msra.gmra.mrb[0].mxu1 %v359_v44  ;;  %v361_v49 = vmax.f32 %v355_v45, 0.0 }
 0x11e   : > { %v360_v48 = vmax.f32 %v350_v47, 0.0 }
 0x120   : > { %666 = vmatprep.mubr.f32.mxu1 %v360_v48 }
 0x121   : > { %667 = vmatmul.mubr.f32.gmra.mrb[2].mxu1 %v361_v49 }
 0x1f0   : > { %v665_v51 = vpop.f32.mrb[0].mxu1 }
 0x1f1   : > { %v457_v52 = vadd.f32 %v665_v51, %v576_v50  ;;  %v451_v53 = vpop.f32.mrb[1].mxu1 }
 0x1f2   : > { %v452_v54 = vadd.f32 %v576_v50, %v451_v53 }
 0x1f3   : > { %471 = vst [vmem:[%s235_s8 + $0x8] sm:$0xff] %v457_v52 }
 0x1f4   : > { %470 = vst [vmem:[%s235_s8] sm:$0xff] %v452_v54  ;;  %v668_v55 = vpop.f32.mrb[2].mxu1 }
 0x1f5   : > { %v467_v56 = vadd.f32 %v668_v55, %v576_v50  ;;  %v461_v57 = vpop.f32.mrb[3].mxu1 }
 0x1f6   : > { %v462_v58 = vadd.f32 %v576_v50, %v461_v57 }
 0x1f7   : > { %473 = vst [vmem:[%s235_s8 + $0x18] sm:$0xff] %v467_v56 }
 0x1f8   : > { %472 = vst [vmem:[%s235_s8 + $0x10] sm:$0xff] %v462_v58 }
 0x1f9   : > { %808 = shalt.err (!%p805_p7)
}
 0x1fa   : > { %s809_s12 = scalar_lea.hbm %s1032_s20, 512  ;;  %s813_s14 = scalar_lea.hbm %s1081_s6, 1024 }
 0x1fb   : > { %p810_p8 = scmp.ne.s32.totalorder %s1032_s20, %s809_s12  ;;  %p814_p1 = scmp.lt.u32.totalorder %s1032_s20, %s1081_s6 }
 0x1fc   : > { %p815_p0 = scmp.lt.u32.totalorder %s813_s14, %s809_s12  ;;  %p817_p6 = scmp.lt.u32.totalorder %s809_s12, %s1032_s20 }
 0x1fd   : > { %p811_p11 = pnand %p810_p8, %p1092_p9 }
 0x1fe   : > { %p816_p5 = por %p815_p0, %p814_p1 }
 0x1ff   : > { %p812_p13 = pneg %p811_p11 }
 0x200   : > { %p818_p10 = por %p817_p6, %p816_p5 }
 0x202   : > { %p819_p12 = pnand %p818_p10, %p812_p13 }
 0x204   : > { %822 = shalt.err (!%p819_p12)
}
 0x205   : > { %s867_s8 = smov 128   ;;  %s868_s17 = smov 8  }
 0x206   : > { %717 = dma.vmem_to_hbm [thread:$0]  (%p1092_p9), %s1027_s16, 512, %s1032_s20, %s1034_s25, %s867_s8, %s867_s8, %s868_s17  }
 0x207 PF: > { %p729_p2 = scmp.ge.s32.totalorder %s861_s23, 2  ;;  %s503_s18 = sand.u32 1, %s849_s0  }
 0x208   : > { %p1093_p3 = scmp.ne.s32.totalorder %s1086_s7, 0  ;;  %s504_s19 = scalar_lea.sflag [#allocation6], %s503_s18 }
 0x20a   : > { %p724_p4 = pnand %p729_p2, %p1093_p3 }
 0x20c   : > { %844 = dma.done.wait (!%p724_p4), %s504_s19, 512  }
 0x20d   : > { %846 = vsyncadd (!%p724_p4), %s504_s19, 4294966784  ;;  %p18_p7 = scmp.ge.s32.totalorder %s929_s26, 4   ;;  %s1094_s0 = smov %s853_s21 }
 0x20e   : > { %s1095_s21 = smov %s857_s22  ;;  %s1096_s22 = smov %s940_s29 }
 0x20f   : > { %s1097_s23 = smov %s929_s26  ;;  %20 = sbr.rel (!%p18_p7) target bundleno = 4 (0x4), region = 80 }
 0x216   :  { %509 = vsyncpa [#allocation5], 1 }
 0x217   :  { %511 = vsyncpa [#allocation5 + $0x1], 1 }
 0x218   :  { %512 = vsyncpa [#allocation6], 1 }
 0x219   :  { %514 = vsyncpa [#allocation6 + $0x1], 1 }

</bundles_post_ra>
